<compile_context>
chip_gen: v5e
topology: v5e:2x2
jax: 0.10.0
libtpu: 0.0.40
codegen_flags: <defaults>
</compile_context>

<pallas_src>
import functools

import jax
import jax.numpy as jnp
from jax.experimental import pallas as pl
from jax.experimental.pallas import tpu as pltpu


def _round_up(n: int, m: int) -> int:
    return ((n + m - 1) // m) * m


def _vmem_limit_bytes() -> int:
    """Scoped-VMEM limit derived from the actual chip (v5e/v6e: 128 MiB
    physical, v7x: 64 MiB), leaving ~25% headroom for Mosaic scratch."""
    phys = 64 * 1024 * 1024
    try:
        info = pltpu.get_tpu_info()
        phys = int(getattr(info, "vmem_capacity_bytes", phys))
    except Exception:
        pass
    return int(min(phys * 3 // 4, 96 * 1024 * 1024))


def _pick_batch_tile(B, C, H, s_item, x_item, w_item, budget_bytes):
    """Largest batch tile (multiples of 256 preferred, filling the 256-wide
    MXU on v6e/v7x) whose double-buffered working set fits the VMEM budget."""
    if B <= 8:
        return B  # block == full array dim, always legal
    # Resident blocks (W + bias + partial-out), double-buffered by the pipeline.
    fixed = 2 * H * C * w_item + 2 * C * 4 + 2 * 8 * 128 * 4
    # Per batch-row: double-buffered student / x / p_t blocks + f32 temporaries.
    per_row = (2 * (C * s_item + H * x_item) + 2 * C * 4
               + 6 * C * 4 + 2 * H * 4)
    max_rows = max(budget_bytes - fixed, 0) // max(per_row, 1)
    b_cap = _round_up(B, 8)
    for t in (2048, 1536, 1024, 768, 512, 256, 128, 64, 32, 16, 8):
        if t <= b_cap and t <= max_rows:
            return t
    return 8


# -----------------------------------------------------------------------------
# Fused kernel: teacher linear head + softmax-KD loss partial reduction
# -----------------------------------------------------------------------------
def _kd_kernel(student_ref, x_ref, w_ref, b_ref, part_ref, pt_ref, *,
               true_b, batch_tile, needs_row_mask):
    """One batch tile: teacher logits on the MXU, f32 softmax math, reduce to a
    per-tile partial sum (independent across tiles -> 'parallel' grid)."""
    # Frozen teacher forward (input dtypes preserved, f32 accumulate).
    t_logits = jnp.dot(x_ref[...], w_ref[...],
                       preferred_element_type=jnp.float32)
    t_logits = t_logits + b_ref[...].astype(jnp.float32)
    s_logits = student_ref[...].astype(jnp.float32)

    # Teacher softmax (exact divide so p_t sums to 1; also the bwd residual).
    t_max = jnp.max(t_logits, axis=-1, keepdims=True)
    t_exp = jnp.exp(t_logits - t_max)
    p_t = t_exp / jnp.sum(t_exp, axis=-1, keepdims=True)
    pt_ref[...] = p_t

    # Student log-softmax (subtract log-sum instead of per-element divide).
    s_shift = s_logits - jnp.max(s_logits, axis=-1, keepdims=True)
    log_p_s = s_shift - jnp.log(jnp.sum(jnp.exp(s_shift), axis=-1,
                                        keepdims=True))

    # Per-row cross term, then the per-tile (unscaled) partial sum.
    inner = jnp.sum(p_t * log_p_s, axis=-1, keepdims=True)        # (bt, 1)
    if needs_row_mask:  # compile-time: only when the batch axis was padded
        row = (jax.lax.broadcasted_iota(jnp.int32, inner.shape, 0)
               + pl.program_id(0) * batch_tile)
        inner = jnp.where(row < true_b, inner, jnp.float32(0.0))
    partial = jnp.sum(inner)                                       # scalar

    # Broadcast into a native (8, 128) output tile; reduced outside the kernel.
    part_ref[...] = jnp.broadcast_to(partial, part_ref.shape)


@functools.partial(jax.jit, static_argnames=("scale",))
def _kd_forward(student_logits, x, teacher_w, teacher_b, *, scale):
    """Fused teacher-forward + softmax-KD loss.

    Returns (scalar f32 loss, teacher probabilities [B, C] f32)."""
    B, C = student_logits.shape
    Bx, H = x.shape
    assert Bx == B and teacher_w.shape == (H, C) and teacher_b.shape == (C,)

    vmem_limit = _vmem_limit_bytes()
    batch_tile = _pick_batch_tile(
        B, C, H,
        jnp.dtype(student_logits.dtype).itemsize,
        jnp.dtype(x.dtype).itemsize,
        jnp.dtype(teacher_w.dtype).itemsize,
        int(vmem_limit * 0.6))
    b_pad = _round_up(B, batch_tile)
    num_tiles = b_pad // batch_tile

    # No class/hidden padding and no dtype casts: blocks span the full C / H
    # axes, so only the batch axis may need a (cheap, row-only) pad.
    if b_pad != B:
        s_in = jnp.pad(student_logits, ((0, b_pad - B), (0, 0)))
        x_in = jnp.pad(x, ((0, b_pad - B), (0, 0)))
    else:
        s_in, x_in = student_logits, x
    bias_in = teacher_b.reshape(1, C)

    kernel = functools.partial(
        _kd_kernel, true_b=B, batch_tile=batch_tile,
        needs_row_mask=(b_pad != B))

    # TODO(synk): for vocab-scale C (W too large for VMEM) add a trailing
    # class-tile grid axis with an online logsumexp / softmax-sum carried in
    # VMEM scratch instead of keeping W fully resident.
    # TODO(synk): single-buffer the resident W/bias blocks
    # (pipeline_mode=pl.Buffered(1)) once universally supported; the VMEM
    # budget above conservatively assumes they are double-buffered.
    partials, p_t = pl.pallas_call(
        kernel,
        out_shape=(
            jax.ShapeDtypeStruct((8 * num_tiles, 128), jnp.float32),
            jax.ShapeDtypeStruct((b_pad, C), jnp.float32),
        ),
        grid=(num_tiles,),
        in_specs=[
            pl.BlockSpec((batch_tile, C), lambda i: (i, 0)),   # student logits
            pl.BlockSpec((batch_tile, H), lambda i: (i, 0)),   # teacher inputs
            pl.BlockSpec((H, C), lambda i: (0, 0)),            # W (VMEM-resident)
            pl.BlockSpec((1, C), lambda i: (0, 0)),            # bias (resident)
        ],
        out_specs=(
            pl.BlockSpec((8, 128), lambda i: (i, 0)),          # per-tile partial
            pl.BlockSpec((batch_tile, C), lambda i: (i, 0)),   # teacher probs
        ),
        compiler_params=pltpu.CompilerParams(
            dimension_semantics=("parallel",),  # no carried state across tiles
            vmem_limit_bytes=vmem_limit,
        ),
    )(s_in, x_in, teacher_w, bias_in)

    # loss = -scale/B * sum_b sum_c p_t * log_p_s
    #      =  scale * -(log_softmax(s) * softmax(t)).mean() * C
    loss = jnp.float32(-float(scale) / float(B)) * jnp.sum(partials[0::8, 0])
    return loss, p_t[:B]


# -----------------------------------------------------------------------------
# custom_vjp: analytic backward, teacher under no-grad
# -----------------------------------------------------------------------------
@functools.partial(jax.custom_vjp, nondiff_argnums=(4,))
def kd_distillation_loss(student_logits, x, teacher_w, teacher_b, scale):
    loss, _ = _kd_forward(student_logits, x, teacher_w, teacher_b, scale=scale)
    return loss


def _kd_loss_fwd(student_logits, x, teacher_w, teacher_b, scale):
    loss, p_t = _kd_forward(student_logits, x, teacher_w, teacher_b, scale=scale)
    # Teacher probabilities come straight out of the forward kernel, so the
    # backward pass never re-reads x / W nor re-runs the teacher matmul.
    return loss, (student_logits, p_t, x, teacher_w, teacher_b)


def _kd_loss_bwd(scale, residuals, g):
    student_logits, p_t, x, teacher_w, teacher_b = residuals
    p_s = jax.nn.softmax(student_logits.astype(jnp.float32), axis=-1)
    bsz = student_logits.shape[0]
    d_student = (g * (float(scale) / bsz)) * (p_s - p_t)
    # Teacher path runs under no_grad in the reference module -> zero grads.
    return (d_student.astype(student_logits.dtype),
            jnp.zeros_like(x), jnp.zeros_like(teacher_w),
            jnp.zeros_like(teacher_b))


kd_distillation_loss.defvjp(_kd_loss_fwd, _kd_loss_bwd)


# -----------------------------------------------------------------------------
# Handler: host-side bookkeeping mirroring the PyTorch module
# -----------------------------------------------------------------------------
class KnowledgeDistillationLossHandler:
    """JAX/Pallas port of NNCF's KnowledgeDistillationLossHandler.

    The TracingContext "global buffer" / DataParallel storage-device logic is
    host-side Python state (plain dict of lists).  The frozen teacher
    (kd_original_model) is a linear classifier head whose forward is fused
    with the softmax KD loss in one Pallas kernel.
    """

    KD_LOSS_STORAGE_NAME = "kd_loss"

    def __init__(self, teacher_w, teacher_b, scale: float = 1.0):
        self._teacher_w = teacher_w
        self._teacher_b = teacher_b
        self._scale = float(scale)
        self._global_buffer_store = {self.KD_LOSS_STORAGE_NAME: []}

    def zero_kd_loss(self):
        self._global_buffer_store[self.KD_LOSS_STORAGE_NAME] = []

    def get_kd_loss(self):
        store = self._global_buffer_store[self.KD_LOSS_STORAGE_NAME]
        if len(store) == 0:
            return [jnp.zeros(())]
        return store

    def __call__(self, compressed_model_outputs, *teacher_inputs):
        """compressed_model_outputs: student logits [B, C];
        teacher_inputs: latest forward inputs, here a single [B, H] tensor."""
        self.zero_kd_loss()
        (x,) = teacher_inputs
        kd_loss = kd_distillation_loss(compressed_model_outputs, x,
                                       self._teacher_w, self._teacher_b,
                                       self._scale)
        self._global_buffer_store[self.KD_LOSS_STORAGE_NAME].append(kd_loss)
        return kd_loss


# -----------------------------------------------------------------------------
# Demo / self-test
# -----------------------------------------------------------------------------
if __name__ == "__main__":
    key = jax.random.PRNGKey(0)
    k1, k2, k3, k4 = jax.random.split(key, 4)

    B, H, C = 8, 32, 10          # small shapes consistent with the module
    scale = 1.0

    x = jax.random.normal(k1, (B, H), jnp.float32)                # latest fwd inputs
    teacher_w = jax.random.normal(k2, (H, C), jnp.float32) * 0.1  # frozen teacher head
    teacher_b = jax.random.normal(k3, (C,), jnp.float32) * 0.01
    student_logits = jax.random.normal(k4, (B, C), jnp.float32)   # compressed-model out

    handler = KnowledgeDistillationLossHandler(teacher_w, teacher_b, scale=scale)
    loss = handler(student_logits, x)
    loss = jax.block_until_ready(loss)

    # Pure-JAX reference (same f32 teacher matmul) for a forward sanity check.
    def _ref_loss(s):
        t = jnp.dot(x, teacher_w, preferred_element_type=jnp.float32) + teacher_b
        return scale * -jnp.mean(jax.nn.log_softmax(s, axis=1)
                                 * jax.nn.softmax(t, axis=1)) * C

    ref = float(jax.block_until_ready(_ref_loss(student_logits)))
    got = float(loss)
    assert abs(got - ref) <= 2e-3 * max(1.0, abs(ref)), (got, ref)

    # Backward sanity check against jax.grad of the pure-JAX reference.
    g_ref = jax.grad(_ref_loss)(student_logits)
    g_got = jax.grad(lambda s: kd_distillation_loss(
        s, x, teacher_w, teacher_b, scale))(student_logits)
    g_err = float(jnp.max(jnp.abs(g_got - g_ref)))
    assert g_err <= 1e-4, g_err

    stored = handler.get_kd_loss()
    assert len(stored) == 1 and stored[0].shape == ()

    print("KERNEL_OK")
</pallas_src>

<mosaic_0001>
module attributes {stable_mosaic.version = 11 : i64} {
  func.func @_kd_kernel(%arg0: i32, %arg1: memref<8x10xf32, #tpu.memory_space<vmem>>, %arg2: memref<8x32xf32, #tpu.memory_space<vmem>>, %arg3: memref<32x10xf32, #tpu.memory_space<vmem>>, %arg4: memref<1x10xf32, #tpu.memory_space<vmem>>, %arg5: memref<8x128xf32, #tpu.memory_space<vmem>>, %arg6: memref<8x10xf32, #tpu.memory_space<vmem>>) attributes {dimension_semantics = [#tpu.dimension_semantics<parallel>], iteration_bounds = array<i64: 1>, scalar_prefetch = 0 : i64, scratch_operands = 0 : i64, tpu.core_type = #tpu.core_type<tc>, window_params = [{transform_indices = @transform_0, window_bounds = array<i64: 8, 10>}, {transform_indices = @transform_1, window_bounds = array<i64: 8, 32>}, {pipeline_mode = #tpu.pipeline_mode<synchronous>, transform_indices = @transform_2, window_bounds = array<i64: 32, 10>}, {pipeline_mode = #tpu.pipeline_mode<synchronous>, transform_indices = @transform_3, window_bounds = array<i64: 1, 10>}, {transform_indices = @transform_4, window_bounds = array<i64: 8, 128>}, {transform_indices = @transform_5, window_bounds = array<i64: 8, 10>}]} {
    %c0 = arith.constant 0 : index
    %c0_0 = arith.constant 0 : index
    %0 = vector.load %arg2[%c0, %c0_0] : memref<8x32xf32, #tpu.memory_space<vmem>>, vector<8x32xf32>
    %c0_1 = arith.constant 0 : index
    %c0_2 = arith.constant 0 : index
    %1 = vector.load %arg3[%c0_1, %c0_2] : memref<32x10xf32, #tpu.memory_space<vmem>>, vector<32x10xf32>
    %cst = arith.constant dense<0.000000e+00> : vector<8x10xf32>
    %2 = tpu.matmul %0, %1, %cst {dimension_numbers = #tpu.dot_dimension_numbers<[1], [0], [0], [1], [0, 0, 1, 1], [], []>} : vector<8x32xf32>, vector<32x10xf32>, vector<8x10xf32> -> vector<8x10xf32>
    %c0_3 = arith.constant 0 : index
    %c0_4 = arith.constant 0 : index
    %3 = vector.load %arg4[%c0_3, %c0_4] : memref<1x10xf32, #tpu.memory_space<vmem>>, vector<1x10xf32>
    %4 = vector.broadcast %3 : vector<1x10xf32> to vector<8x10xf32>
    %5 = arith.addf %2, %4 : vector<8x10xf32>
    %c0_5 = arith.constant 0 : index
    %c0_6 = arith.constant 0 : index
    %6 = vector.load %arg1[%c0_5, %c0_6] : memref<8x10xf32, #tpu.memory_space<vmem>>, vector<8x10xf32>
    %cst_7 = arith.constant dense<0xFF800000> : vector<8xf32>
    %7 = vector.multi_reduction <maximumf>, %5, %cst_7 [1] : vector<8x10xf32> to vector<8xf32>
    %8 = vector.shape_cast %7 : vector<8xf32> to vector<8x1xf32>
    %9 = vector.broadcast %8 : vector<8x1xf32> to vector<8x10xf32>
    %10 = arith.subf %5, %9 : vector<8x10xf32>
    %11 = math.exp %10 : vector<8x10xf32>
    %cst_8 = arith.constant dense<0.000000e+00> : vector<8xf32>
    %12 = vector.multi_reduction <add>, %11, %cst_8 [1] : vector<8x10xf32> to vector<8xf32>
    %13 = vector.shape_cast %12 : vector<8xf32> to vector<8x1xf32>
    %14 = vector.broadcast %13 : vector<8x1xf32> to vector<8x10xf32>
    %15 = arith.divf %11, %14 : vector<8x10xf32>
    %c0_9 = arith.constant 0 : index
    %c0_10 = arith.constant 0 : index
    %16 = vector.load %arg6[%c0_9, %c0_10] : memref<8x10xf32, #tpu.memory_space<vmem>>, vector<8x10xf32>
    tpu.vector_store %arg6[%c0_9, %c0_10], %15 {strides = array<i32>} : memref<8x10xf32, #tpu.memory_space<vmem>>, vector<8x10xf32>,
    %cst_11 = arith.constant dense<0xFF800000> : vector<8xf32>
    %17 = vector.multi_reduction <maximumf>, %6, %cst_11 [1] : vector<8x10xf32> to vector<8xf32>
    %18 = vector.shape_cast %17 : vector<8xf32> to vector<8x1xf32>
    %19 = vector.broadcast %18 : vector<8x1xf32> to vector<8x10xf32>
    %20 = arith.subf %6, %19 : vector<8x10xf32>
    %21 = math.exp %20 : vector<8x10xf32>
    %cst_12 = arith.constant dense<0.000000e+00> : vector<8xf32>
    %22 = vector.multi_reduction <add>, %21, %cst_12 [1] : vector<8x10xf32> to vector<8xf32>
    %23 = vector.shape_cast %22 : vector<8xf32> to vector<8x1xf32>
    %24 = math.log %23 : vector<8x1xf32>
    %25 = vector.broadcast %24 : vector<8x1xf32> to vector<8x10xf32>
    %26 = arith.subf %20, %25 : vector<8x10xf32>
    %27 = arith.mulf %15, %26 : vector<8x10xf32>
    %cst_13 = arith.constant dense<0.000000e+00> : vector<8xf32>
    %28 = vector.multi_reduction <add>, %27, %cst_13 [1] : vector<8x10xf32> to vector<8xf32>
    %29 = vector.shape_cast %28 : vector<8xf32> to vector<8x1xf32>
    %30 = vector.shape_cast %29 : vector<8x1xf32> to vector<1x8x1xf32>
    %cst_14 = arith.constant dense<0.000000e+00> : vector<1xf32>
    %31 = vector.multi_reduction <add>, %30, %cst_14 [1, 2] : vector<1x8x1xf32> to vector<1xf32>
    %32 = vector.shape_cast %31 : vector<1xf32> to vector<1x1x1xf32>
    %33 = vector.extract %32[0, 0, 0] : f32 from vector<1x1x1xf32>
    %34 = vector.broadcast %33 : f32 to vector<8x128xf32>
    %c0_15 = arith.constant 0 : index
    %c0_16 = arith.constant 0 : index
    %35 = vector.load %arg5[%c0_15, %c0_16] : memref<8x128xf32, #tpu.memory_space<vmem>>, vector<8x128xf32>
    tpu.vector_store %arg5[%c0_15, %c0_16], %34 {strides = array<i32>} : memref<8x128xf32, #tpu.memory_space<vmem>>, vector<8x128xf32>,
    return
  }
  func.func @transform_0(%arg0: i32) -> (i32, i32) {
    %c0_i32 = arith.constant 0 : i32
    %c0_i32_0 = arith.constant 0 : i32
    return %arg0, %c0_i32 : i32, i32
  }
  func.func @transform_1(%arg0: i32) -> (i32, i32) {
    %c0_i32 = arith.constant 0 : i32
    %c0_i32_0 = arith.constant 0 : i32
    return %arg0, %c0_i32 : i32, i32
  }
  func.func @transform_2(%arg0: i32) -> (i32, i32) {
    %c0_i32 = arith.constant 0 : i32
    %c0_i32_0 = arith.constant 0 : i32
    %c0_i32_1 = arith.constant 0 : i32
    return %c0_i32, %c0_i32_0 : i32, i32
  }
  func.func @transform_3(%arg0: i32) -> (i32, i32) {
    %c0_i32 = arith.constant 0 : i32
    %c0_i32_0 = arith.constant 0 : i32
    %c0_i32_1 = arith.constant 0 : i32
    return %c0_i32, %c0_i32_0 : i32, i32
  }
  func.func @transform_4(%arg0: i32) -> (i32, i32) {
    %c0_i32 = arith.constant 0 : i32
    %c0_i32_0 = arith.constant 0 : i32
    return %arg0, %c0_i32 : i32, i32
  }
  func.func @transform_5(%arg0: i32) -> (i32, i32) {
    %c0_i32 = arith.constant 0 : i32
    %c0_i32_0 = arith.constant 0 : i32
    return %arg0, %c0_i32 : i32, i32
  }
}

</mosaic_0001>

<bundles_post_ra>
// kernel: _kd_forward.1
= control target key start
LH: loop header
LB: loop body
LE: loop exit
PB: predicated region body
PF: predicated region fallthrough
CT: control target
= control target key end

     0   :  { %s232_s0 = inlined_call_operand.vmem [shape: f32[8,10], index: 0, kind: input, shape index: {}]   ;;  %s233_s1 = inlined_call_operand.vmem [shape: f32[8,32], index: 1, kind: input, shape index: {}]   ;;  %s234_s2 = inlined_call_operand.vmem [shape: f32[32,10], index: 2, kind: input, shape index: {}]   ;;  %s235_s3 = inlined_call_operand.vmem [shape: f32[1,10], index: 3, kind: input, shape index: {}]   ;;  %s236_s4 = inlined_call_operand.vmem [shape: f32[8,128], index: 4, kind: output, shape index: {0}]   ;;  %s237_s5 = inlined_call_operand.hbm [shape: f32[8,10], index: 5, kind: output, shape index: {1}]  }
   0x1   :  { %v24_v0 = vld [vmem:[%s234_s2 + $0x18] sm:$0xff]  ;;  %v23_v1 = vld [vmem:[%s234_s2 + $0x10] sm:$0xff]  ;;  %v22_v2 = vld [vmem:[%s234_s2 + $0x8] sm:$0xff] }
   0x2   :  { %45 = vmatpush.msra.mxu0 %v24_v0 }
   0x3   :  { %11 = vsyncpa [#allocation3], 0  ;;  %v21_v3 = vld [vmem:[%s234_s2] sm:$0xff]  ;;  %vm29_vm0 = vcmask 261120   ;;  %vm54_vm1 = vcmask 80896   ;;  %vm96_vm6 = vcmask 7168  }
   0x4   :  { %46 = vmatpush.msra.mxu0 %v23_v1  ;;  %v20_v4 = vld [vmem:[%s233_s1] sm:$0xff]  ;;  %s118_s7 = sshll.u32 %s237_s5, 4  ;;  %s119_s7 = int_to_ptr.hbm [resolvable:$true] %s118_s7 }
   0x5   :  { %v133_v5 = vld [vmem:[%s235_s3] ss:$0 sm:$0xff] }
   0x6   :  { %47 = vmatpush.msra.mxu0 %v22_v2  ;;  %v53_v9 = vld [vmem:[%s232_s0] sm:$0xff]  ;;  %s168_s0 = smov [#allocation2]  }
   0x7   :  { %v80_v10 = vsel %vm54_vm1, %v53_v9, -inf  ;;  %s116_s1 = sshll.u32 %s168_s0, 4  ;;  %s117_s1 = int_to_ptr.vmem [resolvable:$true] %s116_s1 }
   0x8   :  { %48 = vmatpush.msra.mxu0 %v21_v3 }
   0x9   :  { %129 = vmatmul.msk.f32.vlgmr.msra.gmra.mxu0 %vm29_vm0, %v20_v4 }
  0x86   :  { %v50_v6 = vpop.f32.mrf.mxu0 }
  0x87   :  { %v51_v7 = vadd.f32 %v133_v5, %v50_v6 }
  0x89   :  { %v55_v8 = vsel %vm54_vm1, %v51_v7, -inf }
  0x8a   :  { %56 = vmax.xlane.f32.xlu0 %v55_v8 }
  0x92   :  { %81 = vmax.xlane.f32.xlu0 %v80_v10 }
  0xfd   :  { %v57_v11 = vpop.xlane.xlu0 %56 }
  0xfe   :  { %v58_v12 = vsub.f32 %v51_v7, %v57_v11 }
 0x100   :  { %v59_v13 = vmul.f32 1.442695, %v58_v12 }
 0x102   :  { %134 = vpow2.f32 %v59_v13 }
 0x105   :  { %v82_v14 = vpop.xlane.xlu0 %81 }
 0x106   :  { %v83_v15 = vsub.f32 %v53_v9, %v82_v14 }
 0x108   :  { %v135_v16 = vpop.eup %134  ;;  %v84_v17 = vmul.f32 1.442695, %v83_v15 }
 0x109   :  { %v61_v18 = vsel %vm54_vm1, %v135_v16, 0.0 }
 0x10a   :  { %136 = vpow2.f32 %v84_v17  ;;  %62 = vadd.xlane.f32.xlu1 %v61_v18 }
 0x110   :  { %v137_v19 = vpop.eup %136 }
 0x111   :  { %v86_v20 = vsel %vm54_vm1, %v137_v19, 0.0 }
 0x112   :  { %87 = vadd.xlane.f32.xlu1 %v86_v20 }
 0x17d   :  { %v63_v21 = vpop.xlane.xlu1 %62 }
 0x17e   :  { %138 = vrcp.f32 %v63_v21  ;;  %v75_v26 = vand.u32 2147483648, %v63_v21  ;;  %v73_v28 = vand.u32 2147483647, %v63_v21  ;;  %vm69_vm3 = vweird.f32 %v63_v21 }
 0x180   :  { %v76_v31 = vor.u32 1.1754944e-38, %v75_v26  ;;  %vm74_vm5 = vcmp.eq.f32.partialorder %v73_v28, 8.507059e+37 }
 0x184   :  { %v139_v22 = vpop.eup %138 }
 0x185   :  { %v65_v23 = vmul.f32 %v139_v22, %v63_v21  ;;  %v88_v24 = vpop.xlane.xlu1 %87  ;;  %vm70_vm2 = vweird.f32 %v139_v22 }
 0x186   :  { %140 = vlog2.f32 %v88_v24  ;;  %vm71_vm4 = vmor %vm69_vm3, %vm70_vm2 }
 0x187   :  { %v66_v25 = vsub.f32 1.0, %v65_v23 }
 0x189   :  { %v67_v27 = vmul.f32 %v139_v22, %v66_v25 }
 0x18b   :  { %v68_v29 = vadd.f32 %v139_v22, %v67_v27 }
 0x18c   :  { %v141_v30 = vpop.eup %140 }
 0x18d   :  { %v90_v32 = vmul.f32 0.6931472, %v141_v30  ;;  %v72_v33 = vsel %vm71_vm4, %v139_v22, %v68_v29 }
 0x18e   :  { %v77_v34 = vsel %vm74_vm5, %v76_v31, %v72_v33 }
 0x18f   :  { %v91_v35 = vsub.f32 %v83_v15, %v90_v32  ;;  %v78_v36 = vmul.f32 %v135_v16, %v77_v34 }
 0x191   :  { %v92_v37 = vmul.f32 %v91_v35, %v78_v36  ;;  %79 = vst.msk [vmem:[#allocation2] sm:$0xff] %vm54_vm1, %v78_v36 }
 0x192   :  { %121 = dma.vmem_to_hbm [thread:$0]  %s117_s1, 128, %s119_s7, [#allocation3]  }
 0x193   :  { %v93_v38 = vsel %vm54_vm1, %v92_v37, 0.0 }
 0x194   :  { %94 = vadd.xlane.f32.xlu2 %v93_v38 }
 0x207   :  { %v95_v39 = vpop.xlane.xlu2 %94 }
 0x208   :  { %v97_v40 = vsel %vm96_vm6, %v95_v39, 0.0 }
 0x209   :  { %98 = vadd.xlane.f32.xlu2 %v97_v40 }
 0x27c   :  { %v99_v41 = vpop.xlane.xlu2 %98 }
 0x27d   :  { %v100_v42 = vrot.slane %v99_v41, 4 }
 0x27f   :  { %v101_v43 = vadd.f32 %v100_v42, %v99_v41 }
 0x281   :  { %v102_v44 = vrot.slane %v101_v43, 2 }
 0x283   :  { %v103_v45 = vadd.f32 %v102_v44, %v101_v43 }
 0x285   :  { %v104_v46 = vrot.slane %v103_v45, 1 }
 0x287   :  { %v105_v47 = vadd.f32 %v104_v46, %v103_v45 }
 0x289   :  { %130 = vpush %v105_v47 }
 0x2ba   :  { %s131_s8 = spop %130 }
 0x2bb   :  { %v107_v48 = vstv %s131_s8 }
 0x2bc   :  { %108 = vst [vmem:[%s236_s4] sm:$0xff] %v107_v48 }
 0x2bd   :  { %166 = dma.done.wait [#allocation3], 128  }
 0x2be   :  { %167 = vsyncadd [#allocation3], 4294967168 }
 0x2bf   :  { %128 = vsyncpa [#allocation3], 1 }

</bundles_post_ra>
